<compile_context>
chip_gen: v5e
topology: v5e:2x2
jax: 0.10.0
libtpu: 0.0.40
codegen_flags: <defaults>
</compile_context>

<pallas_src>
import jax
import jax.numpy as jnp
from jax.experimental import pallas as pl
from jax.experimental.pallas import tpu as pltpu

IN_F, H1_F, H2_F, OUT_F = 16, 64, 32, 1
CHUNK = 256  # batch rows (lanes) processed per inner step


def mlp_kernel(x_ref, w1_ref, b1_ref, w2_ref, b2_ref, w3_ref, b3_ref, o_ref):
    tb = x_ref.shape[0]
    n_chunks = tb // CHUNK

    # Params are tiny and VMEM-resident; load once per grid step.
    w1 = w1_ref[...]          # [64, 16]  bf16
    b1 = b1_ref[...]          # [64, 1]   f32
    w2 = w2_ref[...]          # [32, 64]  bf16
    b2 = b2_ref[...]          # [32, 1]   f32
    w3 = w3_ref[...]          # [32, 1]   f32
    b3 = b3_ref[...]          # [1, 1]    f32

    for c in range(n_chunks):  # static -> fully unrolled, constant offsets
        # x chunk in natural layout, cast to bf16 for the MXU.
        x_c = x_ref[pl.ds(c * CHUNK, CHUNK), :].astype(jnp.bfloat16)  # [256, 16]

        # Layer 1: Linear(16 -> 64) + ReLU.  Contract rhs on its last dim
        # (MXU transposed feed), result is batch-on-lanes: [64, 256] f32.
        h1 = jax.lax.dot_general(
            w1, x_c, (((1,), (1,)), ((), ())),
            preferred_element_type=jnp.float32)
        h1 = jnp.maximum(h1 + b1, 0.0)

        # Layer 2: Linear(64 -> 32) + ReLU (MXU, bf16 in / f32 acc). [32, 256]
        h2 = jnp.dot(w2, h1.astype(jnp.bfloat16),
                     preferred_element_type=jnp.float32)
        h2 = jnp.maximum(h2 + b2, 0.0)

        # Layer 3: Linear(32 -> 1) as VPU multiply + cross-sublane reduce
        # (XLU has slack; avoids an M=1 MXU pass).                 [1, 256]
        out = jnp.sum(h2 * w3, axis=0, keepdims=True) + b3

        o_ref[:, pl.ds(c * CHUNK, CHUNK)] = out.astype(o_ref.dtype)


def bert_wind_speed_predictor(x, params, *, max_tile=8192):
    """x: [batch, 16] float32 -> [batch, 1] float32.

    Params (nn.Linear-style [out, in], biases as columns):
      w1 [64,16], b1 [64,1], w2 [32,64], b2 [32,1], w3 [32,1], b3 [1,1].
    """
    w1, b1, w2, b2, w3, b3 = params
    batch = x.shape[0]

    # Tile size: multiple of CHUNK; single grid step for small batches so
    # latency-sensitive calls pay no pipeline prologue/epilogue.
    max_tile = max(CHUNK, (max_tile // CHUNK) * CHUNK)
    batch_aligned = pl.cdiv(batch, CHUNK) * CHUNK
    tb = min(max_tile, batch_aligned)
    grid = pl.cdiv(batch, tb)

    # bf16 MXU operands: casting the ~6.5 KB of weights here is negligible;
    # x stays f32 in HBM and is cast chunk-wise inside the kernel.
    w1_bf = w1.astype(jnp.bfloat16)
    w2_bf = w2.astype(jnp.bfloat16)

    const = lambda i: (0, 0)  # params: same block every step -> resident

    out = pl.pallas_call(
        mlp_kernel,
        out_shape=jax.ShapeDtypeStruct((1, batch), jnp.float32),
        grid_spec=pltpu.PrefetchScalarGridSpec(
            num_scalar_prefetch=0,
            grid=(grid,),
            in_specs=[
                pl.BlockSpec((tb, IN_F), lambda i: (i, 0)),   # x, natural layout
                pl.BlockSpec((H1_F, IN_F), const),            # w1 (bf16)
                pl.BlockSpec((H1_F, 1), const),               # b1
                pl.BlockSpec((H2_F, H1_F), const),            # w2 (bf16)
                pl.BlockSpec((H2_F, 1), const),               # b2
                pl.BlockSpec((H2_F, 1), const),               # w3 (column)
                pl.BlockSpec((1, 1), const),                  # b3
            ],
            out_specs=pl.BlockSpec((1, tb), lambda i: (0, i)),  # lane-dense
        ),
        compiler_params=pltpu.CompilerParams(
            dimension_semantics=("parallel",),
        ),
    )(x, w1_bf, b1, w2_bf, b2, w3, b3)

    return out.reshape(batch, 1)


def init_params(key):
    """nn.Linear-style init (uniform +/- 1/sqrt(fan_in)), transposed storage."""
    def linear_init(k, fan_in, fan_out):
        kw, kb = jax.random.split(k)
        bound = 1.0 / jnp.sqrt(float(fan_in))
        w = jax.random.uniform(kw, (fan_out, fan_in), jnp.float32, -bound, bound)
        b = jax.random.uniform(kb, (fan_out, 1), jnp.float32, -bound, bound)
        return w, b

    k1, k2, k3 = jax.random.split(key, 3)
    w1, b1 = linear_init(k1, IN_F, H1_F)
    w2, b2 = linear_init(k2, H1_F, H2_F)
    w3, b3 = linear_init(k3, H2_F, OUT_F)
    # Store w3 as a [32, 1] column so it broadcasts against h2 [32, chunk].
    return w1, b1, w2, b2, w3.T, b3


def reference(x, params):
    w1, b1, w2, b2, w3, b3 = params
    h1 = jnp.maximum(x @ w1.T + b1.T, 0.0)
    h2 = jnp.maximum(h1 @ w2.T + b2.T, 0.0)
    return h2 @ w3 + b3  # w3 is [32, 1], b3 is [1, 1]


if __name__ == "__main__":
    key = jax.random.PRNGKey(0)
    key_x, key_x2, key_p = jax.random.split(key, 3)
    params = init_params(key_p)

    # Small demo shape (single grid step).
    batch = 8
    x = jax.random.normal(key_x, (batch, IN_F), dtype=jnp.float32)
    out = jax.block_until_ready(bert_wind_speed_predictor(x, params))
    ref = reference(x, params)
    assert out.shape == (batch, 1)
    # bf16 MXU operands -> deliberately loosened tolerance vs. f32 reference.
    assert jnp.allclose(out, ref, atol=2e-2, rtol=2e-2), float(jnp.max(jnp.abs(out - ref)))

    # Multi-step grid + ragged batch (partial last block, no host-side padding).
    batch2 = 300
    x2 = jax.random.normal(key_x2, (batch2, IN_F), dtype=jnp.float32)
    out2 = jax.block_until_ready(
        bert_wind_speed_predictor(x2, params, max_tile=256))
    ref2 = reference(x2, params)
    assert out2.shape == (batch2, 1)
    assert jnp.allclose(out2, ref2, atol=2e-2, rtol=2e-2), float(jnp.max(jnp.abs(out2 - ref2)))

    print("KERNEL_OK")
</pallas_src>

<mosaic_0001>
module attributes {stable_mosaic.version = 11 : i64} {
  func.func @mlp_kernel(%arg0: i32, %arg1: memref<256x16xf32, #tpu.memory_space<vmem>>, %arg2: memref<64x16xbf16, #tpu.memory_space<vmem>>, %arg3: memref<64x1xf32, #tpu.memory_space<vmem>>, %arg4: memref<32x64xbf16, #tpu.memory_space<vmem>>, %arg5: memref<32x1xf32, #tpu.memory_space<vmem>>, %arg6: memref<32x1xf32, #tpu.memory_space<vmem>>, %arg7: memref<1x1xf32, #tpu.memory_space<vmem>>, %arg8: memref<1x256xf32, #tpu.memory_space<vmem>>) attributes {dimension_semantics = [#tpu.dimension_semantics<parallel>], iteration_bounds = array<i64: 1>, scalar_prefetch = 0 : i64, scratch_operands = 0 : i64, tpu.core_type = #tpu.core_type<tc>, window_params = [{transform_indices = @transform_0, window_bounds = array<i64: 256, 16>}, {pipeline_mode = #tpu.pipeline_mode<synchronous>, transform_indices = @transform_1, window_bounds = array<i64: 64, 16>}, {pipeline_mode = #tpu.pipeline_mode<synchronous>, transform_indices = @transform_2, window_bounds = array<i64: 64, 1>}, {pipeline_mode = #tpu.pipeline_mode<synchronous>, transform_indices = @transform_3, window_bounds = array<i64: 32, 64>}, {pipeline_mode = #tpu.pipeline_mode<synchronous>, transform_indices = @transform_4, window_bounds = array<i64: 32, 1>}, {pipeline_mode = #tpu.pipeline_mode<synchronous>, transform_indices = @transform_5, window_bounds = array<i64: 32, 1>}, {pipeline_mode = #tpu.pipeline_mode<synchronous>, transform_indices = @transform_6, window_bounds = array<i64: 1, 1>}, {transform_indices = @transform_7, window_bounds = array<i64: 1, 256>}]} {
    %c0 = arith.constant 0 : index
    %c0_0 = arith.constant 0 : index
    %0 = vector.load %arg2[%c0, %c0_0] : memref<64x16xbf16, #tpu.memory_space<vmem>>, vector<64x16xbf16>
    %c0_1 = arith.constant 0 : index
    %c0_2 = arith.constant 0 : index
    %1 = vector.load %arg3[%c0_1, %c0_2] : memref<64x1xf32, #tpu.memory_space<vmem>>, vector<64x1xf32>
    %c0_3 = arith.constant 0 : index
    %c0_4 = arith.constant 0 : index
    %2 = vector.load %arg4[%c0_3, %c0_4] : memref<32x64xbf16, #tpu.memory_space<vmem>>, vector<32x64xbf16>
    %c0_5 = arith.constant 0 : index
    %c0_6 = arith.constant 0 : index
    %3 = vector.load %arg5[%c0_5, %c0_6] : memref<32x1xf32, #tpu.memory_space<vmem>>, vector<32x1xf32>
    %c0_7 = arith.constant 0 : index
    %c0_8 = arith.constant 0 : index
    %4 = vector.load %arg6[%c0_7, %c0_8] : memref<32x1xf32, #tpu.memory_space<vmem>>, vector<32x1xf32>
    %c0_9 = arith.constant 0 : index
    %c0_10 = arith.constant 0 : index
    %5 = vector.load %arg7[%c0_9, %c0_10] : memref<1x1xf32, #tpu.memory_space<vmem>>, vector<1x1xf32>
    %c0_11 = arith.constant 0 : index
    %c0_12 = arith.constant 0 : index
    %6 = vector.load %arg1[%c0_11, %c0_12] : memref<256x16xf32, #tpu.memory_space<vmem>>, vector<256x16xf32>
    %7 = arith.truncf %6 : vector<256x16xf32> to vector<256x16xbf16>
    %cst = arith.constant dense<0.000000e+00> : vector<64x256xf32>
    %8 = tpu.matmul %0, %7, %cst {dimension_numbers = #tpu.dot_dimension_numbers<[1], [1], [0], [0], [0, 0, 1, 0], [], []>} : vector<64x16xbf16>, vector<256x16xbf16>, vector<64x256xf32> -> vector<64x256xf32>
    %9 = vector.broadcast %1 : vector<64x1xf32> to vector<64x256xf32>
    %10 = arith.addf %8, %9 : vector<64x256xf32>
    %cst_13 = arith.constant 0.000000e+00 : f32
    %11 = vector.broadcast %cst_13 : f32 to vector<64x256xf32>
    %12 = arith.maximumf %10, %11 : vector<64x256xf32>
    %13 = arith.truncf %12 : vector<64x256xf32> to vector<64x256xbf16>
    %cst_14 = arith.constant dense<0.000000e+00> : vector<32x256xf32>
    %14 = tpu.matmul %2, %13, %cst_14 {dimension_numbers = #tpu.dot_dimension_numbers<[1], [0], [0], [1], [0, 0, 1, 1], [], []>} : vector<32x64xbf16>, vector<64x256xbf16>, vector<32x256xf32> -> vector<32x256xf32>
    %15 = vector.broadcast %3 : vector<32x1xf32> to vector<32x256xf32>
    %16 = arith.addf %14, %15 : vector<32x256xf32>
    %cst_15 = arith.constant 0.000000e+00 : f32
    %17 = vector.broadcast %cst_15 : f32 to vector<32x256xf32>
    %18 = arith.maximumf %16, %17 : vector<32x256xf32>
    %19 = vector.broadcast %4 : vector<32x1xf32> to vector<32x256xf32>
    %20 = arith.mulf %18, %19 : vector<32x256xf32>
    %cst_16 = arith.constant dense<0.000000e+00> : vector<256xf32>
    %21 = vector.multi_reduction <add>, %20, %cst_16 [0] : vector<32x256xf32> to vector<256xf32>
    %22 = vector.shape_cast %21 : vector<256xf32> to vector<1x256xf32>
    %23 = vector.broadcast %5 : vector<1x1xf32> to vector<1x256xf32>
    %24 = arith.addf %22, %23 : vector<1x256xf32>
    %c0_17 = arith.constant 0 : index
    %c0_18 = arith.constant 0 : index
    %25 = vector.load %arg8[%c0_17, %c0_18] : memref<1x256xf32, #tpu.memory_space<vmem>>, vector<1x256xf32>
    tpu.vector_store %arg8[%c0_17, %c0_18], %24 {strides = array<i32>} : memref<1x256xf32, #tpu.memory_space<vmem>>, vector<1x256xf32>,
    return
  }
  func.func @transform_0(%arg0: i32) -> (i32, i32) {
    %c0_i32 = arith.constant 0 : i32
    %c0_i32_0 = arith.constant 0 : i32
    return %arg0, %c0_i32 : i32, i32
  }
  func.func @transform_1(%arg0: i32) -> (i32, i32) {
    %c0_i32 = arith.constant 0 : i32
    %c0_i32_0 = arith.constant 0 : i32
    %c0_i32_1 = arith.constant 0 : i32
    return %c0_i32, %c0_i32_0 : i32, i32
  }
  func.func @transform_2(%arg0: i32) -> (i32, i32) {
    %c0_i32 = arith.constant 0 : i32
    %c0_i32_0 = arith.constant 0 : i32
    %c0_i32_1 = arith.constant 0 : i32
    return %c0_i32, %c0_i32_0 : i32, i32
  }
  func.func @transform_3(%arg0: i32) -> (i32, i32) {
    %c0_i32 = arith.constant 0 : i32
    %c0_i32_0 = arith.constant 0 : i32
    %c0_i32_1 = arith.constant 0 : i32
    return %c0_i32, %c0_i32_0 : i32, i32
  }
  func.func @transform_4(%arg0: i32) -> (i32, i32) {
    %c0_i32 = arith.constant 0 : i32
    %c0_i32_0 = arith.constant 0 : i32
    %c0_i32_1 = arith.constant 0 : i32
    return %c0_i32, %c0_i32_0 : i32, i32
  }
  func.func @transform_5(%arg0: i32) -> (i32, i32) {
    %c0_i32 = arith.constant 0 : i32
    %c0_i32_0 = arith.constant 0 : i32
    %c0_i32_1 = arith.constant 0 : i32
    return %c0_i32, %c0_i32_0 : i32, i32
  }
  func.func @transform_6(%arg0: i32) -> (i32, i32) {
    %c0_i32 = arith.constant 0 : i32
    %c0_i32_0 = arith.constant 0 : i32
    %c0_i32_1 = arith.constant 0 : i32
    return %c0_i32, %c0_i32_0 : i32, i32
  }
  func.func @transform_7(%arg0: i32) -> (i32, i32) {
    %c0_i32 = arith.constant 0 : i32
    %c0_i32_0 = arith.constant 0 : i32
    return %c0_i32, %arg0 : i32, i32
  }
}

</mosaic_0001>

<bundles_post_ra>
// kernel: tpu_custom_call.1
= control target key start
LH: loop header
LB: loop body
LE: loop exit
PB: predicated region body
PF: predicated region fallthrough
CT: control target
= control target key end

     0   :  { %s797_s0 = inlined_call_operand.vmem [shape: f32[8,16], index: 0, kind: input, shape index: {}]   ;;  %s798_s1 = inlined_call_operand.vmem [shape: bf16[64,16], index: 1, kind: input, shape index: {}]   ;;  %s799_s2 = inlined_call_operand.vmem [shape: f32[64,1], index: 2, kind: input, shape index: {}]   ;;  %s800_s3 = inlined_call_operand.vmem [shape: bf16[32,64], index: 3, kind: input, shape index: {}]   ;;  %s801_s4 = inlined_call_operand.vmem [shape: f32[32,1], index: 4, kind: input, shape index: {}]   ;;  %s802_s5 = inlined_call_operand.vmem [shape: f32[32,1], index: 5, kind: input, shape index: {}]   ;;  %s803_s6 = inlined_call_operand.<no memory space> [shape: f32[1,1], index: 6, kind: input, shape index: {}]   ;;  %s804_s7 = inlined_call_operand.hbm [shape: f32[1,8], index: 7, kind: output, shape index: {}]  }
   0x1   :  { %v12_v0 = vstv %s803_s6 }
   0x2   :  { %13 = vst [vmem:[#allocation2] sm:$0x1] %v12_v0 }
   0x3   :  { %14 = vsyncpa [#allocation4], 0  ;;  %v73_v1 = vld [vmem:[%s797_s0 + $0x70] sm:$0xff]  ;;  %v74_v2 = vld [vmem:[%s797_s0 + $0x78] sm:$0xff]  ;;  %vm167_vm0 = vcmask 130048   ;;  %v563_v40 = vmov 0  }
   0x4   :  { %v98_v3 = vpack.c.bf16 %v74_v2, %v73_v1  ;;  %v89_v4 = vld [vmem:[%s797_s0 + $0xf0] sm:$0xff]  ;;  %v90_v5 = vld [vmem:[%s797_s0 + $0xf8] sm:$0xff]  ;;  %v71_v7 = vld [vmem:[%s797_s0 + $0x60] sm:$0xff]  ;;  %534 = vset.pattern.permute.xlu0 %v563_v40  ;;  %535 = vset.pattern.permute.xlu1 %v563_v40  ;;  %vm340_vm1 = vcmask 523264   ;;  %vm450_vm2 = vcmask 1040384  }
   0x5   :  { %v106_v6 = vpack.c.bf16 %v90_v5, %v89_v4  ;;  %v72_v8 = vld [vmem:[%s797_s0 + $0x68] sm:$0xff]  ;;  %v87_v10 = vld [vmem:[%s797_s0 + $0xe0] sm:$0xff]  ;;  %v69_v17 = vld [vmem:[%s797_s0 + $0x50] sm:$0xff]  ;;  %536 = vset.pattern.permute.xlu2 %v563_v40 }
   0x6   :  { %v202_v9 = vsel %vm167_vm0, %v98_v3, 0  ;;  %v88_v11 = vld [vmem:[%s797_s0 + $0xe8] sm:$0xff]  ;;  %v97_v13 = vpack.c.bf16 %v72_v8, %v71_v7  ;;  %v70_v18 = vld [vmem:[%s797_s0 + $0x58] sm:$0xff]  ;;  %v85_v19 = vld [vmem:[%s797_s0 + $0xd0] sm:$0xff] }
   0x7   :  { %228 = vmatpush.bf16.xpose.msra.mxu0 %v202_v9  ;;  %v226_v12 = vsel %vm167_vm0, %v106_v6, 0  ;;  %516 = vmatpush.bf16.xpose.msra.mxu2 %v202_v9  ;;  %v105_v14 = vpack.c.bf16 %v88_v11, %v87_v10  ;;  %v86_v20 = vld [vmem:[%s797_s0 + $0xd8] sm:$0xff]  ;;  %v96_v21 = vpack.c.bf16 %v70_v18, %v69_v17  ;;  %v67_v25 = vld [vmem:[%s797_s0 + $0x40] sm:$0xff]  ;;  %v68_v26 = vld [vmem:[%s797_s0 + $0x48] sm:$0xff] }
   0x8   :  { %257 = vmatpush.bf16.xpose.msra.mxu1 %v226_v12  ;;  %524 = vmatpush.bf16.xpose.msra.mxu3 %v226_v12  ;;  %v199_v15 = vsel %vm167_vm0, %v97_v13, 0  ;;  %v104_v22 = vpack.c.bf16 %v86_v20, %v85_v19  ;;  %v83_v27 = vld [vmem:[%s797_s0 + $0xc0] sm:$0xff]  ;;  %v84_v28 = vld [vmem:[%s797_s0 + $0xc8] sm:$0xff]  ;;  %v95_v29 = vpack.c.bf16 %v68_v26, %v67_v25  ;;  %v65_v33 = vld [vmem:[%s797_s0 + $0x30] sm:$0xff] }
   0x9   :  { %v223_v16 = vsel %vm167_vm0, %v105_v14, 0  ;;  %v196_v23 = vsel %vm167_vm0, %v96_v21, 0  ;;  %v103_v30 = vpack.c.bf16 %v84_v28, %v83_v27  ;;  %v66_v34 = vld [vmem:[%s797_s0 + $0x38] sm:$0xff]  ;;  %v81_v35 = vld [vmem:[%s797_s0 + $0xb0] sm:$0xff]  ;;  %v63_v43 = vld [vmem:[%s797_s0 + $0x20] sm:$0xff] }
   0xa   :  { %v220_v24 = vsel %vm167_vm0, %v104_v22, 0  ;;  %v193_v31 = vsel %vm167_vm0, %v95_v29, 0  ;;  %v82_v36 = vld [vmem:[%s797_s0 + $0xb8] sm:$0xff]  ;;  %v94_v37 = vpack.c.bf16 %v66_v34, %v65_v33  ;;  %v44_v38 = vld [vmem:[%s799_s2 + $0x30] sm:$0xff]  ;;  %v64_v44 = vld [vmem:[%s797_s0 + $0x28] sm:$0xff] }
   0xb   :  { %v217_v32 = vsel %vm167_vm0, %v103_v30, 0  ;;  %v102_v39 = vpack.c.bf16 %v82_v36, %v81_v35  ;;  %139 = vperm.xlu0 %534, %v44_v38   ;;  %v79_v45 = vld [vmem:[%s797_s0 + $0xa0] sm:$0xff]  ;;  %v80_v46 = vld [vmem:[%s797_s0 + $0xa8] sm:$0xff]  ;;  %v45_v47 = vld [vmem:[%s799_s2 + $0x38] sm:$0xff]  ;;  %v93_v49 = vpack.c.bf16 %v64_v44, %v63_v43 }
   0xc   :  { %v190_v41 = vsel %vm167_vm0, %v94_v37, 0  ;;  %v42_v48 = vld [vmem:[%s799_s2 + $0x20] sm:$0xff]  ;;  %v101_v50 = vpack.c.bf16 %v80_v46, %v79_v45  ;;  %v61_v53 = vld [vmem:[%s797_s0 + $0x10] sm:$0xff]  ;;  %v62_v54 = vld [vmem:[%s797_s0 + $0x18] sm:$0xff] }
   0xd   :  { %v214_v42 = vsel %vm167_vm0, %v102_v39, 0  ;;  %129 = vperm.xlu1 %535, %v42_v48   ;;  %v187_v51 = vsel %vm167_vm0, %v93_v49, 0  ;;  %v77_v55 = vld [vmem:[%s797_s0 + $0x90] sm:$0xff]  ;;  %v78_v56 = vld [vmem:[%s797_s0 + $0x98] sm:$0xff]  ;;  %v43_v57 = vld [vmem:[%s799_s2 + $0x28] sm:$0xff]  ;;  %v92_v59 = vpack.c.bf16 %v62_v54, %v61_v53 }
   0xe   :  { %v211_v52 = vsel %vm167_vm0, %v101_v50, 0  ;;  %v38_v58 = vld [vmem:[%s799_s2] sm:$0xff]  ;;  %v100_v60 = vpack.c.bf16 %v78_v56, %v77_v55  ;;  %v60_v0 = vld [vmem:[%s797_s0 + $0x8] sm:$0xff]  ;;  %v52_v9 = vld [vmem:[%s801_s4 + $0x10] sm:$0xff] }
   0xf   :  { %229 = vmatpush.bf16.xpose.msra.mxu0 %v199_v15  ;;  %517 = vmatpush.bf16.xpose.msra.mxu2 %v199_v15  ;;  %v184_v61 = vsel %vm167_vm0, %v92_v59, 0  ;;  %v59_v63 = vld [vmem:[%s797_s0] sm:$0xff]  ;;  %v76_v2 = vld [vmem:[%s797_s0 + $0x88] sm:$0xff]  ;;  %v513_v12 = vld [vmem:[%s798_s1 + $0x18] sm:$0xff] }
  0x10   :  { %258 = vmatpush.bf16.xpose.msra.mxu1 %v223_v16  ;;  %525 = vmatpush.bf16.xpose.msra.mxu3 %v223_v16  ;;  %v208_v62 = vsel %vm167_vm0, %v100_v60, 0  ;;  %v75_v1 = vld [vmem:[%s797_s0 + $0x80] sm:$0xff]  ;;  %v39_v3 = vld [vmem:[%s799_s2 + $0x8] sm:$0xff]  ;;  %v91_v5 = vpack.c.bf16 %v60_v0, %v59_v63  ;;  %v40_v14 = vld [vmem:[%s799_s2 + $0x10] sm:$0xff] }
  0x11   :  { %v51_v4 = vld [vmem:[%s801_s4 + $0x8] sm:$0xff]  ;;  %v99_v6 = vpack.c.bf16 %v76_v2, %v75_v1  ;;  %v54_v10 = vld [vmem:[%s802_s5] sm:$0xff]  ;;  %v57_v15 = vld [vmem:[%s802_s5 + $0x18] sm:$0xff]  ;;  %119 = vperm.xlu2 %536, %v40_v14  }
  0x12   :  { %v181_v7 = vsel %vm167_vm0, %v91_v5, 0  ;;  %v510_v11 = vld [vmem:[%s798_s1] sm:$0xff]  ;;  %v55_v13 = vld [vmem:[%s802_s5 + $0x8] sm:$0xff]  ;;  %v41_v16 = vld [vmem:[%s799_s2 + $0x18] sm:$0xff] }
  0x13   :  { %144 = vperm.xlu0 %534, %v45_v47   ;;  %v205_v8 = vsel %vm167_vm0, %v99_v6, 0  ;;  %v58_v17 = vld [vmem:[#allocation2] sm:$0x1]  ;;  %v511_v18 = vld [vmem:[%s798_s1 + $0x8] sm:$0xff]  ;;  %v53_v20 = vld [vmem:[%s801_s4 + $0x18] sm:$0xff] }
  0x14   :  { %v50_v19 = vld [vmem:[%s801_s4] sm:$0xff]  ;;  %v512_v21 = vld [vmem:[%s798_s1 + $0x10] sm:$0xff] }
  0x15   :  { %134 = vperm.xlu1 %535, %v43_v57   ;;  %v56_v22 = vld [vmem:[%s802_s5 + $0x10] sm:$0xff] }
  0x17   :  { %230 = vmatpush.bf16.xpose.msra.mxu0 %v196_v23  ;;  %518 = vmatpush.bf16.xpose.msra.mxu2 %v196_v23 }
  0x18   :  { %259 = vmatpush.bf16.xpose.msra.mxu1 %v220_v24  ;;  %526 = vmatpush.bf16.xpose.msra.mxu3 %v220_v24 }
  0x19   :  { %124 = vperm.xlu2 %536, %v41_v16  }
  0x1b   :  { %109 = vperm.xlu0 %534, %v38_v58  }
  0x1d   :  { %114 = vperm.xlu1 %535, %v39_v3  }
  0x1f   :  { %231 = vmatpush.bf16.xpose.msra.mxu0 %v193_v31  ;;  %519 = vmatpush.bf16.xpose.msra.mxu2 %v193_v31 }
  0x20   :  { %260 = vmatpush.bf16.xpose.msra.mxu1 %v217_v32  ;;  %527 = vmatpush.bf16.xpose.msra.mxu3 %v217_v32 }
  0x21   :  { %312 = vperm.xlu2 %536, %v50_v19  }
  0x23   :  { %317 = vperm.xlu0 %534, %v51_v4  }
  0x25   :  { %322 = vperm.xlu1 %535, %v52_v9  }
  0x27   :  { %232 = vmatpush.bf16.xpose.msra.mxu0 %v190_v41  ;;  %520 = vmatpush.bf16.xpose.msra.mxu2 %v190_v41 }
  0x28   :  { %261 = vmatpush.bf16.xpose.msra.mxu1 %v214_v42  ;;  %528 = vmatpush.bf16.xpose.msra.mxu3 %v214_v42 }
  0x29   :  { %327 = vperm.xlu2 %536, %v53_v20  }
  0x2b   :  { %395 = vperm.xlu0 %534, %v54_v10  }
  0x2d   :  { %400 = vperm.xlu1 %535, %v55_v13  }
  0x2f   :  { %233 = vmatpush.bf16.xpose.msra.mxu0 %v187_v51  ;;  %521 = vmatpush.bf16.xpose.msra.mxu2 %v187_v51 }
  0x30   :  { %262 = vmatpush.bf16.xpose.msra.mxu1 %v211_v52  ;;  %529 = vmatpush.bf16.xpose.msra.mxu3 %v211_v52 }
  0x31   :  { %405 = vperm.xlu2 %536, %v56_v22  }
  0x33   :  { %410 = vperm.xlu0 %534, %v57_v15  }
  0x35   :  { %441 = vperm.xlu1 %535, %v58_v17  }
  0x37   :  { %234 = vmatpush.bf16.xpose.msra.mxu0 %v184_v61  ;;  %522 = vmatpush.bf16.xpose.msra.mxu2 %v184_v61 }
  0x38   :  { %263 = vmatpush.bf16.xpose.msra.mxu1 %v208_v62  ;;  %530 = vmatpush.bf16.xpose.msra.mxu3 %v208_v62 }
  0x3f   :  { %235 = vmatpush.bf16.xpose.msra.mxu0 %v181_v7  ;;  %523 = vmatpush.bf16.xpose.msra.mxu2 %v181_v7 }
  0x40   :  { %264 = vmatpush.bf16.xpose.msra.mxu1 %v205_v8  ;;  %531 = vmatpush.bf16.xpose.msra.mxu3 %v205_v8 }
  0x46   :  { %490 = vmatmul.msk.bf16.vlgmr.msra.gmra.mxu0 %vm167_vm0, %v510_v11  ;;  %493 = vmatmul.msk.bf16.vlgmr.msra.gmra.mxu2 %vm167_vm0, %v513_v12 }
  0x47   :  { %494 = vmatmul.msk.bf16.vlgmr.msra.gmra.mxu1 %vm167_vm0, %v510_v11  ;;  %497 = vmatmul.msk.bf16.vlgmr.msra.gmra.mxu3 %vm167_vm0, %v513_v12 }
  0x56   :  { %491 = vmatmul.msk.bf16.gmra.mxu0 %vm167_vm0, %v511_v18 }
  0x57   :  { %495 = vmatmul.msk.bf16.gmra.mxu1 %vm167_vm0, %v511_v18 }
  0x66   :  { %492 = vmatmul.msk.bf16.gmra.mxu0 %vm167_vm0, %v512_v21 }
  0x67   :  { %496 = vmatmul.msk.bf16.gmra.mxu1 %vm167_vm0, %v512_v21 }
  0x6b   :  { %v120_v48 = vpop.permute.xlu2 %119 }
  0x73   :  { %v125_v53 = vpop.permute.xlu2 %124 }
  0x7d   :  { %v140_v25 = vpop.permute.xlu0 %139 }
  0x7f   :  { %v130_v45 = vpop.permute.xlu1 %129 }
  0x85   :  { %v145_v32 = vpop.permute.xlu0 %144 }
  0x87   :  { %v135_v49 = vpop.permute.xlu1 %134 }
  0x8d   :  { %v110_v4 = vpop.permute.xlu0 %109 }
  0x8f   :  { %v115_v59 = vpop.permute.xlu1 %114 }
  0xc3   :  { %v237_v23 = vpop.f32.mrf.mxu0 }
  0xc4   :  { %v266_v24 = vpop.f32.mrf.mxu1  ;;  %v238_v11 = vadd.f32 %v237_v23, %v110_v4  ;;  %v515_v23 = vld [vmem:[%s800_s3 + $0x8] sm:$0xff] }
  0xc5   :  { %v267_v13 = vadd.f32 %v266_v24, %v110_v4 }
  0xc6   :  { %v286_v19 = vmax.f32 %v238_v11, 0.0 }
  0xc7   :  { %v287_v20 = vmax.f32 %v267_v13, 0.0 }
  0xc9   :  { %v252_v26 = vpop.f32.mrf.mxu2 }
  0xca   :  { %v281_v27 = vpop.f32.mrf.mxu3  ;;  %v253_v30 = vadd.f32 %v252_v26, %v140_v25 }
  0xcb   :  { %v239_v28 = vpop.f32.mrf.mxu0  ;;  %v282_v31 = vadd.f32 %v281_v27, %v140_v25  ;;  %v514_v25 = vld [vmem:[%s800_s3] sm:$0xff]  ;;  %v313_v27 = vpop.permute.xlu2 %312 }
  0xcc   :  { %v268_v29 = vpop.f32.mrf.mxu1  ;;  %v298_v34 = vmax.f32 %v253_v30, 0.0  ;;  %v240_v5 = vadd.f32 %v239_v28, %v115_v59  ;;  %v318_v28 = vpop.permute.xlu0 %317 }
  0xcd   :  { %v299_v38 = vmax.f32 %v282_v31, 0.0  ;;  %v269_v8 = vadd.f32 %v268_v29, %v115_v59  ;;  %v323_v31 = vpop.permute.xlu1 %322 }
  0xce   :  { %v288_v15 = vmax.f32 %v240_v5, 0.0 }
  0xcf   :  { %v289_v17 = vmax.f32 %v269_v8, 0.0 }
  0xd0   :  { %v302_v21 = vpack.c.bf16 %v288_v15, %v286_v19 }
  0xd1   :  { %v254_v33 = vpop.f32.mrf.mxu2  ;;  %v303_v22 = vpack.c.bf16 %v289_v17, %v287_v20 }
  0xd2   :  { %v255_v35 = vadd.f32 %v254_v33, %v145_v32  ;;  %v283_v36 = vpop.f32.mrf.mxu3 }
  0xd3   :  { %v242_v37 = vpop.f32.mrf.mxu0  ;;  %v284_v39 = vadd.f32 %v283_v36, %v145_v32  ;;  %v328_v32 = vpop.permute.xlu2 %327 }
  0xd4   :  { %v271_v40 = vpop.f32.mrf.mxu1  ;;  %v300_v41 = vmax.f32 %v255_v35, 0.0  ;;  %v243_v62 = vadd.f32 %v242_v37, %v120_v48 }
  0xd5   :  { %v301_v42 = vmax.f32 %v284_v39, 0.0  ;;  %v272_v1 = vadd.f32 %v271_v40, %v120_v48  ;;  %v396_v39 = vpop.permute.xlu0 %395 }
  0xd6   :  { %v308_v43 = vpack.c.bf16 %v300_v41, %v298_v34  ;;  %v290_v12 = vmax.f32 %v243_v62, 0.0 }
  0xd7   :  { %v309_v44 = vpack.c.bf16 %v301_v42, %v299_v38  ;;  %v291_v14 = vmax.f32 %v272_v1, 0.0 }
  0xd8   :  { %351 = vmatpush.bf16.msrb.mxu2 %v308_v43 }
  0xd9   :  { %370 = vmatpush.bf16.msrb.mxu3 %v309_v44 }
  0xdb   :  { %v244_v46 = vpop.f32.mrf.mxu0 }
  0xdc   :  { %v273_v47 = vpop.f32.mrf.mxu1  ;;  %v245_v56 = vadd.f32 %v244_v46, %v125_v53  ;;  %v401_v46 = vpop.permute.xlu1 %400 }
  0xdd   :  { %v274_v60 = vadd.f32 %v273_v47, %v125_v53  ;;  %v411_v62 = vpop.permute.xlu0 %410 }
  0xde   :  { %v292_v6 = vmax.f32 %v245_v56, 0.0 }
  0xdf   :  { %v293_v9 = vmax.f32 %v274_v60, 0.0 }
  0xe0   :  { %v304_v16 = vpack.c.bf16 %v292_v6, %v290_v12 }
  0xe1   :  { %v305_v18 = vpack.c.bf16 %v293_v9, %v291_v14 }
  0xe3   :  { %v247_v50 = vpop.f32.mrf.mxu0 }
  0xe4   :  { %v276_v51 = vpop.f32.mrf.mxu1  ;;  %v248_v52 = vadd.f32 %v247_v50, %v130_v45  ;;  %v406_v50 = vpop.permute.xlu2 %405 }
  0xe5   :  { %v277_v54 = vadd.f32 %v276_v51, %v130_v45  ;;  %v442_v15 = vpop.permute.xlu1 %441 }
  0xe6   :  { %v294_v63 = vmax.f32 %v248_v52, 0.0 }
  0xe7   :  { %v295_v2 = vmax.f32 %v277_v54, 0.0 }
  0xeb   :  { %v249_v55 = vpop.f32.mrf.mxu0 }
  0xec   :  { %v250_v57 = vadd.f32 %v249_v55, %v135_v49  ;;  %v278_v58 = vpop.f32.mrf.mxu1 }
  0xed   :  { %v279_v61 = vadd.f32 %v278_v58, %v135_v49 }
  0xee   :  { %v296_v0 = vmax.f32 %v250_v57, 0.0 }
  0xef   :  { %v297_v3 = vmax.f32 %v279_v61, 0.0 }
  0xf0   :  { %v306_v7 = vpack.c.bf16 %v296_v0, %v294_v63 }
  0xf1   :  { %v307_v10 = vpack.c.bf16 %v297_v3, %v295_v2 }
  0xf2   :  { %352 = vmatpush.bf16.msrb.mxu2 %v306_v7 }
  0xf3   :  { %371 = vmatpush.bf16.msrb.mxu3 %v307_v10 }
  0xf6   :  { %353 = vmatpush.bf16.msrb.mxu2 %v304_v16 }
  0xf7   :  { %372 = vmatpush.bf16.msrb.mxu3 %v305_v18  ;;  %v444_v18 = vperm.slane %v442_v15, 0 }
  0xfa   :  { %354 = vmatpush.bf16.msrb.mxu2 %v302_v21  ;;  %v453_v21 = vlaneseq }
  0xfb   :  { %373 = vmatpush.bf16.msrb.mxu3 %v303_v22 }
  0xfc   :  { %vm455_vm3 = vcmp.lt.s32.totalorder %v453_v21, 256 }
  0xfd   :  { %506 = vmatmul.msk.bf16.vlgmr.msrb.gmra.mxu2 %vm340_vm1, %v514_v25 }
  0xfe   :  { %508 = vmatmul.msk.bf16.vlgmr.msrb.gmra.mxu3 %vm340_vm1, %v514_v25 }
 0x10d   :  { %507 = vmatmul.msk.bf16.gmra.mxu2 %vm340_vm1, %v515_v23 }
 0x10e   :  { %509 = vmatmul.msk.bf16.gmra.mxu3 %vm340_vm1, %v515_v23 }
 0x180   :  { %v356_v24 = vpop.f32.mrf.mxu2 }
 0x181   :  { %v375_v26 = vpop.f32.mrf.mxu3  ;;  %v357_v36 = vadd.f32 %v356_v24, %v313_v27 }
 0x182   :  { %v376_v40 = vadd.f32 %v375_v26, %v313_v27 }
 0x183   :  { %v385_v44 = vmax.f32 %v357_v36, 0.0 }
 0x184   :  { %v386_v47 = vmax.f32 %v376_v40, 0.0 }
 0x185   :  { %v413_v53 = vmul.f32 %v396_v39, %v385_v44 }
 0x186   :  { %v414_v57 = vmul.f32 %v396_v39, %v386_v47 }
 0x188   :  { %v358_v29 = vpop.f32.mrf.mxu2 }
 0x189   :  { %v377_v30 = vpop.f32.mrf.mxu3  ;;  %v359_v33 = vadd.f32 %v358_v29, %v318_v28 }
 0x18a   :  { %v378_v34 = vadd.f32 %v377_v30, %v318_v28 }
 0x18b   :  { %v387_v42 = vmax.f32 %v359_v33, 0.0 }
 0x18c   :  { %v388_v43 = vmax.f32 %v378_v34, 0.0 }
 0x18d   :  { %v415_v49 = vmul.f32 %v401_v46, %v387_v42 }
 0x18e   :  { %v416_v51 = vmul.f32 %v401_v46, %v388_v43 }
 0x18f   :  { %v421_v60 = vadd.f32 %v415_v49, %v413_v53 }
 0x190   :  { %v361_v35 = vpop.f32.mrf.mxu2  ;;  %v430_v63 = vadd.f32 %v416_v51, %v414_v57 }
 0x191   :  { %v362_v37 = vadd.f32 %v361_v35, %v323_v31  ;;  %v380_v38 = vpop.f32.mrf.mxu3 }
 0x192   :  { %v381_v41 = vadd.f32 %v380_v38, %v323_v31 }
 0x193   :  { %v389_v45 = vmax.f32 %v362_v37, 0.0 }
 0x194   :  { %v390_v48 = vmax.f32 %v381_v41, 0.0 }
 0x195   :  { %v417_v54 = vmul.f32 %v406_v50, %v389_v45 }
 0x196   :  { %v418_v58 = vmul.f32 %v406_v50, %v390_v48 }
 0x197   :  { %v422_v1 = vadd.f32 %v421_v60, %v417_v54 }
 0x198   :  { %v363_v52 = vpop.f32.mrf.mxu2  ;;  %v431_v3 = vadd.f32 %v430_v63, %v418_v58 }
 0x199   :  { %v364_v55 = vadd.f32 %v363_v52, %v328_v32  ;;  %v382_v56 = vpop.f32.mrf.mxu3 }
 0x19a   :  { %v383_v59 = vadd.f32 %v382_v56, %v328_v32 }
 0x19b   :  { %v391_v61 = vmax.f32 %v364_v55, 0.0 }
 0x19c   :  { %v392_v0 = vmax.f32 %v383_v59, 0.0 }
 0x19d   :  { %v419_v2 = vmul.f32 %v411_v62, %v391_v61 }
 0x19e   :  { %v420_v4 = vmul.f32 %v411_v62, %v392_v0 }
 0x19f   :  { %v423_v5 = vadd.f32 %v422_v1, %v419_v2 }
 0x1a0   :  { %v432_v6 = vadd.f32 %v431_v3, %v420_v4 }
 0x1a1   :  { %v424_v7 = vrot.slane %v423_v5, 4 }
 0x1a2   :  { %v433_v8 = vrot.slane %v432_v6, 4 }
 0x1a3   :  { %v425_v9 = vadd.f32 %v424_v7, %v423_v5 }
 0x1a4   :  { %v434_v10 = vadd.f32 %v433_v8, %v432_v6 }
 0x1a5   :  { %v426_v11 = vrot.slane %v425_v9, 2 }
 0x1a6   :  { %v435_v12 = vrot.slane %v434_v10, 2 }
 0x1a7   :  { %v427_v13 = vadd.f32 %v426_v11, %v425_v9 }
 0x1a8   :  { %v436_v14 = vadd.f32 %v435_v12, %v434_v10 }
 0x1a9   :  { %v428_v16 = vrot.slane %v427_v13, 1 }
 0x1aa   :  { %v437_v17 = vrot.slane %v436_v14, 1 }
 0x1ab   :  { %v429_v19 = vadd.f32 %v428_v16, %v427_v13 }
 0x1ac   :  { %v438_v20 = vadd.f32 %v437_v17, %v436_v14 }
 0x1ad   :  { %v445_v25 = vadd.f32 %v444_v18, %v429_v19 }
 0x1ae   :  { %v446_v22 = vadd.f32 %v444_v18, %v438_v20 }
 0x1b0   :  { %v449_v23 = vrot.slane %v446_v22, 7 }
 0x1b2   :  { %v451_v24 = vsel %vm450_vm2, %v445_v25, %v449_v23 }
 0x1b3   :  { %457 = vst.msk [vmem:[#allocation3] sm:$0x3] %vm455_vm3, %v451_v24 }
 0x1b4   :  { %461 = vsyncadd [#allocation4], 16  ;;  %s465_s10 = sshll.u32 %s804_s7, 4  ;;  %s564_s6 = smov [#allocation3]   ;;  %s466_s10 = int_to_ptr.hbm [resolvable:$true] %s465_s10 }
 0x1b5   :  { %s463_s11 = sshll.u32 %s564_s6, 4  ;;  %s464_s11 = int_to_ptr.vmem [resolvable:$true] %s463_s11 }
 0x1b6   :  { %468 = dma.vmem_to_hbm [thread:$0]  %s464_s11, 16, %s466_s10, [#allocation4]  }
 0x1b7   :  { %561 = dma.done.wait [#allocation4], 32  }
 0x1b8   :  { %562 = vsyncadd [#allocation4], 4294967264 }
 0x1b9   :  { %473 = vsyncpa [#allocation4], 1 }

</bundles_post_ra>
